<compile_context>
chip_gen: v7x
topology: tpu7x:2x2x1
jax: 0.10.0
libtpu: 0.0.40
codegen_flags: <defaults>
</compile_context>

<pallas_src>
import jax
import jax.numpy as jnp
from jax.experimental import pallas as pl
from jax.experimental.pallas import tpu as pltpu


def _frozen_bn_kernel(scale_ref, shift_ref, x_ref, o_ref):
    """y = x * scale + shift.

    scale_ref / shift_ref : (ct, 1)        float32
    x_ref / o_ref         : (nb, ct, hw_t) input dtype
    (ct, 1) right-aligns against (nb, ct, hw_t), so the per-channel broadcast
    needs no reshape in-kernel.
    """
    scale = scale_ref[...]
    shift = shift_ref[...]
    y = x_ref[...].astype(jnp.float32) * scale + shift
    o_ref[...] = y.astype(o_ref.dtype)


def _pick_tiles(N, C, hw, itemsize, target_bytes=4 * 1024 * 1024):
    """Choose (nb, ct, hw_t) so a data block is ~target_bytes.

    Constraints honored:
      * hw_t multiple of 128 (or the full hw)        -> lane-dense stores
      * ct multiple of the sublane packing (or == C) -> whole packed vregs
      * nb folds batch until the byte target is hit
      * keep >= 2 grid steps when batch is the only splittable axis (v7x 2 TCs)
    """
    sub = max(8, 32 // itemsize)  # 8 for f32, 16 for bf16, 32 for int8/fp8

    # Spatial tile: split only when it is lane-dense to do so AND the minimum
    # channel tile alone would already exceed the byte target.
    if hw % 128 == 0 and sub * hw * itemsize > target_bytes:
        hw_t = (target_bytes // (sub * itemsize)) // 128 * 128
        hw_t = max(128, min(int(hw_t), hw))
    else:
        hw_t = hw  # full extent -> always a legal block shape

    # Channel tile.
    if C <= sub:
        ct = C
    else:
        ct = (target_bytes // (hw_t * itemsize)) // sub * sub
        ct = max(sub, min(int(ct), C))
        if ct >= C:
            ct = C

    # Batch tile: fold images until the block reaches the byte target.
    block_bytes = max(1, ct * hw_t * itemsize)
    nb = max(1, min(N, int(target_bytes // block_bytes)))

    # v7x megacore: if channel/spatial already collapsed to one block each,
    # keep at least 2 steps along the (parallel) batch axis.
    if pl.cdiv(C, ct) * pl.cdiv(hw, hw_t) == 1 and N > 1:
        nb = min(nb, -(-N // 2))  # ceil(N / 2) -> cdiv(N, nb) >= 2

    return nb, ct, hw_t


def frozen_batch_norm_2d(x, weight, bias, running_mean, running_var, eps=1e-5):
    """x: (N, C, H, W); weight/bias/running_mean/running_var: (C,)."""
    N, C, H, W = x.shape
    hw = H * W

    # O(C) precompute in float32 (matches PyTorch's f32 buffer math).
    w32 = weight.astype(jnp.float32)
    b32 = bias.astype(jnp.float32)
    rm32 = running_mean.astype(jnp.float32)
    rv32 = running_var.astype(jnp.float32)
    scale1 = w32 * jax.lax.rsqrt(rv32 + jnp.float32(eps))   # (C,)
    shift1 = b32 - rm32 * scale1                            # (C,)
    scale = scale1.reshape(C, 1)
    shift = shift1.reshape(C, 1)

    x3 = x.reshape(N, C, hw)

    nb, ct, hw_t = _pick_tiles(N, C, hw, jnp.dtype(x.dtype).itemsize)

    # Channel blocks outermost so the (ct, 1) param tile is reused across all
    # inner batch/spatial steps; every axis is independent ("parallel").
    grid = (pl.cdiv(C, ct), pl.cdiv(N, nb), pl.cdiv(hw, hw_t))

    param_spec = pl.BlockSpec((ct, 1), lambda c, n, h: (c, 0))
    data_spec = pl.BlockSpec((nb, ct, hw_t), lambda c, n, h: (n, c, h))

    out3 = pl.pallas_call(
        _frozen_bn_kernel,
        out_shape=jax.ShapeDtypeStruct((N, C, hw), x.dtype),
        grid_spec=pltpu.PrefetchScalarGridSpec(
            num_scalar_prefetch=0,
            grid=grid,
            in_specs=[param_spec, param_spec, data_spec],
            out_specs=data_spec,
        ),
        compiler_params=pltpu.CompilerParams(
            dimension_semantics=("parallel", "parallel", "parallel"),
            # 2x(in) + 2x(out) double buffers at ~4 MiB blocks = ~16 MiB;
            # 32 MiB is safe on v5e (128 MiB phys), v6e (128), v7x (64 phys,
            # 32 scoped) -- do NOT raise toward 64 MiB because of v7x.
            vmem_limit_bytes=32 * 1024 * 1024,
        ),
    )(scale, shift, x3)

    return out3.reshape(N, C, H, W)


if __name__ == "__main__":
    key = jax.random.PRNGKey(0)
    N, C, H, W = 2, 4, 16, 16
    k1, k2, k3, k4, k5 = jax.random.split(key, 5)

    x = jax.random.normal(k1, (N, C, H, W), dtype=jnp.float32)
    # Deterministic "frozen" buffers, perturbed so the affine map is non-trivial.
    weight = jnp.ones((C,), jnp.float32) + 0.1 * jax.random.normal(k2, (C,))
    bias = 0.1 * jax.random.normal(k3, (C,))
    running_mean = 0.1 * jax.random.normal(k4, (C,))
    running_var = jnp.ones((C,), jnp.float32) + 0.1 * jnp.abs(
        jax.random.normal(k5, (C,)))
    eps = 1e-5

    y = frozen_batch_norm_2d(x, weight, bias, running_mean, running_var, eps)
    y = jax.block_until_ready(y)

    # Reference (pure JAX, mirrors the PyTorch forward exactly).
    w4 = weight.reshape(1, C, 1, 1)
    b4 = bias.reshape(1, C, 1, 1)
    rv4 = running_var.reshape(1, C, 1, 1)
    rm4 = running_mean.reshape(1, C, 1, 1)
    ref_scale = w4 * jax.lax.rsqrt(rv4 + eps)
    ref = x * ref_scale + (b4 - rm4 * ref_scale)

    assert y.shape == (N, C, H, W)
    assert y.dtype == x.dtype
    assert jnp.allclose(y, ref, atol=1e-5, rtol=1e-5)
    print("KERNEL_OK")
</pallas_src>

<mosaic_0001>
module attributes {stable_mosaic.version = 11 : i64} {
  func.func @_frozen_bn_kernel(%arg0: i32, %arg1: i32, %arg2: i32, %arg3: memref<4x1xf32, #tpu.memory_space<vmem>>, %arg4: memref<4x1xf32, #tpu.memory_space<vmem>>, %arg5: memref<1x4x256xf32, #tpu.memory_space<vmem>>, %arg6: memref<1x4x256xf32, #tpu.memory_space<vmem>>) attributes {dimension_semantics = [#tpu.dimension_semantics<parallel>, #tpu.dimension_semantics<parallel>, #tpu.dimension_semantics<parallel>], iteration_bounds = array<i64: 1, 2, 1>, scalar_prefetch = 0 : i64, scratch_operands = 0 : i64, tpu.core_type = #tpu.core_type<tc>, window_params = [{transform_indices = @transform_0, window_bounds = array<i64: 4, 1>}, {transform_indices = @transform_1, window_bounds = array<i64: 4, 1>}, {transform_indices = @transform_2, window_bounds = array<i64: 1, 4, 256>}, {transform_indices = @transform_3, window_bounds = array<i64: 1, 4, 256>}]} {
    %c0 = arith.constant 0 : index
    %c0_0 = arith.constant 0 : index
    %0 = vector.load %arg3[%c0, %c0_0] : memref<4x1xf32, #tpu.memory_space<vmem>>, vector<4x1xf32>
    %c0_1 = arith.constant 0 : index
    %c0_2 = arith.constant 0 : index
    %1 = vector.load %arg4[%c0_1, %c0_2] : memref<4x1xf32, #tpu.memory_space<vmem>>, vector<4x1xf32>
    %c0_3 = arith.constant 0 : index
    %c0_4 = arith.constant 0 : index
    %c0_5 = arith.constant 0 : index
    %2 = vector.load %arg5[%c0_3, %c0_4, %c0_5] : memref<1x4x256xf32, #tpu.memory_space<vmem>>, vector<1x4x256xf32>
    %3 = vector.shape_cast %0 : vector<4x1xf32> to vector<1x4x1xf32>
    %4 = vector.broadcast %3 : vector<1x4x1xf32> to vector<1x4x256xf32>
    %5 = arith.mulf %2, %4 : vector<1x4x256xf32>
    %6 = vector.shape_cast %1 : vector<4x1xf32> to vector<1x4x1xf32>
    %7 = vector.broadcast %6 : vector<1x4x1xf32> to vector<1x4x256xf32>
    %8 = arith.addf %5, %7 : vector<1x4x256xf32>
    %c0_6 = arith.constant 0 : index
    %c0_7 = arith.constant 0 : index
    %c0_8 = arith.constant 0 : index
    %9 = vector.load %arg6[%c0_6, %c0_7, %c0_8] : memref<1x4x256xf32, #tpu.memory_space<vmem>>, vector<1x4x256xf32>
    tpu.vector_store %arg6[%c0_6, %c0_7, %c0_8], %8 {strides = array<i32>} : memref<1x4x256xf32, #tpu.memory_space<vmem>>, vector<1x4x256xf32>,
    return
  }
  func.func @transform_0(%arg0: i32, %arg1: i32, %arg2: i32) -> (i32, i32) {
    %c0_i32 = arith.constant 0 : i32
    %c0_i32_0 = arith.constant 0 : i32
    return %arg0, %c0_i32 : i32, i32
  }
  func.func @transform_1(%arg0: i32, %arg1: i32, %arg2: i32) -> (i32, i32) {
    %c0_i32 = arith.constant 0 : i32
    %c0_i32_0 = arith.constant 0 : i32
    return %arg0, %c0_i32 : i32, i32
  }
  func.func @transform_2(%arg0: i32, %arg1: i32, %arg2: i32) -> (i32, i32, i32) {
    %c0_i32 = arith.constant 0 : i32
    return %arg1, %arg0, %arg2 : i32, i32, i32
  }
  func.func @transform_3(%arg0: i32, %arg1: i32, %arg2: i32) -> (i32, i32, i32) {
    %c0_i32 = arith.constant 0 : i32
    return %arg1, %arg0, %arg2 : i32, i32, i32
  }
}

</mosaic_0001>

<bundles_post_ra>
// kernel: tpu_custom_call.1
= control target key start
LH: loop header
LB: loop body
LE: loop exit
PB: predicated region body
PF: predicated region fallthrough
CT: control target
= control target key end

     0   :  { %8 = vsyncpa [#allocation3], 0  ;;  %s719_s0 = inlined_call_operand.vmem [shape: f32[4,1], index: 0, kind: input, shape index: {}]   ;;  %s720_s1 = inlined_call_operand.vmem [shape: f32[4,1], index: 1, kind: input, shape index: {}]   ;;  %s721_s2 = inlined_call_operand.vmem [shape: f32[2,4,256], index: 2, kind: input, shape index: {}]   ;;  %s722_s3 = inlined_call_operand.hbm [shape: f32[2,4,256], index: 3, kind: output, shape index: {}]  }
   0x1   :  { %10 = vsyncpa [#allocation3 + $0x1], 0  ;;  %s601_s12 = smov 0   ;;  %s603_s13 = smov 0  }
   0x2   :  { %s605_s14 = smov 0   ;;  %s607_s15 = smov 0  }
   0x3   :  { %s609_s16 = smov 0   ;;  %s611_s17 = smov 0  }
   0x4 LB: > { %s423_s18 = sadd.s32 4294967295, %s576_s17   ;;  %s424_s19 = sadd.s32 4294967294, %s576_s17   ;;  %s576_s17 = sphi %s611_s17, %s16_s17   ;;  %s572_s16 = sphi %s609_s16, %s729_s16   ;;  %s568_s15 = sphi %s607_s15, %s728_s15   ;;  %s564_s14 = sphi %s605_s14, %s727_s14   ;;  %s560_s13 = sphi %s603_s13, %s726_s13   ;;  %s556_s12 = sphi %s601_s12, %s725_s12  }
   0x5   : > { %s31_s20 = sadd.s32 1, %s572_s16  ;;  %s128_s21 = sadd.s32 1, %s564_s14 }
   0x6   : > { %p33_p0 = scmp.ge.s32.totalorder %s31_s20, 2  ;;  %p138_p1 = scmp.ne.s32.totalorder %s564_s14, %s560_s13 }
   0x7   : > { %p139_p2 = scmp.eq.s32.totalorder %s423_s18, 1  ;;  %p144_p3 = scmp.ne.s32.totalorder %s560_s13, %s556_s12 }
   0x8   : > { %s731_s20 = smov (%p33_p0, %s31_s20), 0  ;;  %p145_p5 = scmp.eq.s32.totalorder %s424_s19, 1 }
   0x9   : > { %p641_p4 = por %p139_p2, %p138_p1  ;;  %s121_s23 = ssub.s32 %s572_s16, %s731_s20 }
   0xa   : > { %p429_p6 = scmp.ge.s32.totalorder %s576_s17, 1  ;;  %p126_p7 = scmp.eq.s32.totalorder %s121_s23, 0 }
   0xb   : > { %p648_p8 = por %p145_p5, %p144_p3  ;;  %p194_p9 = scmp.lt.s32.totalorder %s576_s17, 3 }
   0xc   : > { %s654_s25 = scalar_select %p126_p7, %s564_s14, %s128_s21  }
   0xd   : > { %p195_p10 = pnand %p429_p6, %p194_p9 }
   0xe   : > { %v257_v0 = vld [vmem:[%s719_s0] sm:$0xf] (!%p195_p10)  ;;  %v578_v1 = vmov (!%p195_p10), 0   ;;  %p243_p11 = scmp.lt.s32.totalorder (!%p195_p10), %s568_s15, 1  ;;  %v579_v3 = vmov (!%p195_p10), 839922192   ;;  %v267_v5 = vlaneseq (!%p195_p10) }
   0xf   : > { %198 = sbr.rel (%p195_p10) target bundleno = 166 (0xa6), region = 32  ;;  %497 = vset.pattern.permute.xlu0 (!%p195_p10), %v578_v1  ;;  %v258_v2 = vld [vmem:[%s720_s1] sm:$0xf] (!%p195_p10)  ;;  %v265_v4 = vunpack.c.l.s4 (!%p195_p10), %v579_v3  ;;  %s231_s4 = sand.u32 (!%p195_p10), 1, %s560_s13  }
  0x10   : > { %262 = vperm.xlu0 (!%p195_p10), %497, %v257_v0   ;;  %v268_v7 = vshrl.u32 (!%p195_p10), %v267_v5, 7  ;;  %s430_s6 = sshll.u32 (!%p195_p10), %s231_s4, 3  ;;  %s439_s10 = sshll.u32 (!%p195_p10), %s568_s15, 7 }
  0x11   : > { %v266_v6 = vunpack.c.0.s8 (!%p195_p10), %v265_v4  ;;  %s233_s11 = scalar_lea.vmem (!%p195_p10), [#allocation2], %s430_s6  ;;  %s672_s23 = scalar_lea.hbm (!%p195_p10), %s722_s3, %s439_s10 }
  0x12   : > { %s306_s18 = sshll.u32 (!%p195_p10), %s233_s11, 4  ;;  %s288_s26 = scalar_lea.sflag (!%p195_p10), [#allocation3], %s231_s4  ;;  %s674_s18 = int_to_ptr.vmem [resolvable:$true] %s306_s18 }
  0x13   : > { %v269_v8 = vsub.s32 (!%p195_p10), %v266_v6, %v268_v7  ;;  %s498_s27 = scalar_lea.vmem (!%p195_p10), %s674_s18, 128 }
  0x14   : > { %275 = vperm.xlu0 (!%p195_p10), %497, %v258_v2   ;;  %p499_p12 = scmp.ne.s32.totalorder (!%p195_p10), %s674_s18, %s498_s27 }
  0x16   : > { %s244_s30 = scalar_select %p243_p11, %s568_s15, 1 }
  0x17   : > { %p500_p13 = pnand %p499_p12, %p641_p4  ;;  %s580_s15 = smov [#allocation2]  }
  0x18   : > { %s438_s5 = sshll.u32 %s244_s30, 3  ;;  %s502_s28 = sshll.u32 %s580_s15, 4  ;;  %s503_s28 = int_to_ptr.vmem [resolvable:$false] %s502_s28 }
  0x19   : > { %s254_s9 = scalar_lea.vmem %s721_s2, %s438_s5  ;;  %p501_p0 = pneg %p500_p13 }
  0x1a   : > { %v259_v11 = vld [vmem:[%s254_s9] sm:$0xff]  ;;  %s504_s29 = scalar_lea.vmem %s503_s28, 256  ;;  %p505_p1 = scmp.lt.s32.totalorder %s674_s18, %s503_s28 }
  0x1b   : > { %p506_p2 = scmp.lt.s32.totalorder %s504_s29, %s498_s27 }
  0x1d   : > { %p507_p3 = por %p506_p2, %p505_p1 }
  0x1f   : > { %p508_p5 = pnand %p507_p3, %p501_p0 }
  0x8f   : > { %v263_v9 = vpop.permute.xlu0 %262 }
  0x90   : > { %v270_v10 = vrot.slane %v263_v9, %v269_v8 }
  0x92   : > { %v272_v13 = vmul.f32 %v270_v10, %v259_v11 }
  0x93   : > { %v276_v12 = vpop.permute.xlu0 %275 }
  0x94   : > { %v283_v14 = vrot.slane %v276_v12, %v269_v8 }
  0x96   : > { %v285_v15 = vadd.f32 %v283_v14, %v272_v13 }
  0x98   : > { %286 = vst [vmem:[%s233_s11] sm:$0xff] %v285_v15 }
  0x99   : > { %511 = shalt.err (!%p508_p5)
}
  0x9a   : > { %s512_s30 = scalar_lea.hbm %s672_s23, 128  ;;  %s516_s6 = scalar_lea.hbm %s722_s3, 256 }
  0x9b   : > { %p513_p6 = scmp.ne.s32.totalorder %s672_s23, %s512_s30  ;;  %p517_p10 = scmp.lt.u32.totalorder %s672_s23, %s722_s3 }
  0x9c   : > { %p518_p11 = scmp.lt.u32.totalorder %s516_s6, %s512_s30  ;;  %p520_p13 = scmp.lt.u32.totalorder %s512_s30, %s672_s23 }
  0x9d   : > { %p514_p7 = pnand %p513_p6, %p641_p4 }
  0x9e   : > { %p519_p12 = por %p518_p11, %p517_p10 }
  0x9f   : > { %p515_p9 = pneg %p514_p7 }
  0xa0   : > { %p521_p0 = por %p520_p13, %p519_p12 }
  0xa2   : > { %p522_p1 = pnand %p521_p0, %p515_p9 }
  0xa4   : > { %525 = shalt.err (!%p522_p1)
}
  0xa5   : > { %440 = dma.vmem_to_hbm [thread:$0]  (%p641_p4), %s674_s18, 128, %s672_s23, %s288_s26  }
  0xa6 PF: > { %p446_p2 = scmp.ge.s32.totalorder %s576_s17, 2  ;;  %s318_s9 = sand.u32 1, %s556_s12  }
  0xa7   : > { %s319_s10 = scalar_lea.sflag [#allocation3], %s318_s9 }
  0xa8   : > { %p443_p3 = pnand %p446_p2, %p648_p8 }
  0xaa   : > { %551 = dma.done.wait (!%p443_p3), %s319_s10, 128  }
  0xab   : > { %553 = vsyncadd (!%p443_p3), %s319_s10, 4294967168  ;;  %s16_s17 = sadd.s32 1, %s576_s17   ;;  %s725_s12 = smov %s560_s13 }
  0xac   : > { %p13_p5 = scmp.ge.s32.totalorder %s16_s17, 4   ;;  %s726_s13 = smov %s564_s14 }
  0xad   : > { %s727_s14 = smov %s654_s25  ;;  %s728_s15 = smov %s572_s16 }
  0xae   : > { %s729_s16 = smov %s731_s20  ;;  %15 = sbr.rel (!%p13_p5) target bundleno = 4 (0x4), region = 73 }
  0xb5   :  { %324 = vsyncpa [#allocation3], 1 }
  0xb6   :  { %326 = vsyncpa [#allocation3 + $0x1], 1 }

</bundles_post_ra>
